<compile_context>
chip_gen: v7x
topology: tpu7x:2x2x1
jax: 0.10.0
libtpu: 0.0.40
codegen_flags: <defaults>
</compile_context>

<pallas_src>
import functools

import jax
import jax.numpy as jnp
from jax.experimental import pallas as pl
from jax.experimental.pallas import tpu as pltpu


LEAKY_SLOPE = 0.2
BN_EPS = 1e-5


# ----------------------------------------------------------------------------
# Shared math (used verbatim by the kernel body AND the matched JAX reference)
# ----------------------------------------------------------------------------
def _leaky_relu(x):
    return jnp.where(x > 0, x, LEAKY_SLOPE * x)


def _dot_bf16(a, w):
    # bf16 MXU operands, f32 accumulation.
    return jnp.dot(a.astype(jnp.bfloat16), w.astype(jnp.bfloat16),
                   preferred_element_type=jnp.float32)


def _bn_train_folded(h, gamma, beta):
    """BatchNorm1d with batch statistics (biased var), affine folded into one
    per-feature scale/offset; stats computed in a single pass over h."""
    mean = jnp.mean(h, axis=0, keepdims=True)
    mean_sq = jnp.mean(h * h, axis=0, keepdims=True)
    var = jnp.maximum(mean_sq - mean * mean, 0.0)
    scale = gamma * jax.lax.rsqrt(var + BN_EPS)
    return h * scale + (beta - mean * scale)


def _forward_core(x, eps, w1, w2, w3, wd1, wd2, wd3,
                  g1, be1, g2, be2, b3, bd1, bd2, bd3, latent_dim):
    """Full VAE forward on arrays. b1/b2 are intentionally absent: they cancel
    exactly under the BatchNorm mean subtraction."""
    # ---- encoder ----
    h = _dot_bf16(x, w1)
    h = _leaky_relu(_bn_train_folded(h, g1, be1))
    h = _dot_bf16(h, w2)
    h = _leaky_relu(_bn_train_folded(h, g2, be2))
    hid = _dot_bf16(h, w3) + b3                       # [B, 2L] = [mu | logvar]
    z_mu = hid[:, :latent_dim]
    z_logvar = hid[:, latent_dim:]
    # ---- reparameterization trick (exp(logvar), as in the PyTorch module) ----
    z = eps * jnp.exp(z_logvar) + z_mu
    # ---- decoder ----
    d = _leaky_relu(_dot_bf16(z, wd1) + bd1)
    d = _leaky_relu(_dot_bf16(d, wd2) + bd2)
    x_rec = _dot_bf16(d, wd3) + bd3                   # [B, input_dim]
    return x_rec, hid


# ----------------------------------------------------------------------------
# Pallas kernel
# ----------------------------------------------------------------------------
def vae_fused_kernel(x_ref, eps_ref,
                     w1_ref, w2_ref, w3_ref,
                     wd1_ref, wd2_ref, wd3_ref,
                     vec_ref,
                     out_ref,
                     *, input_dim, hidden_dim, latent_dim):
    H, L2, D = hidden_dim, 2 * latent_dim, input_dim

    # Packed per-feature vectors: one [8, P] operand, one DMA.
    vec = vec_ref[...]
    g1, be1 = vec[0:1, :H], vec[1:2, :H]
    g2, be2 = vec[2:3, :H], vec[3:4, :H]
    b3 = vec[4:5, :L2]
    bd1, bd2 = vec[5:6, :H], vec[6:7, :H]
    bd3 = vec[7:8, :D]

    x_rec, hid = _forward_core(
        x_ref[...], eps_ref[...],
        w1_ref[...], w2_ref[...], w3_ref[...],
        wd1_ref[...], wd2_ref[...], wd3_ref[...],
        g1, be1, g2, be2, b3, bd1, bd2, bd3, latent_dim)

    # Single lane-contiguous output slab: [x_rec | mu | logvar].
    out_ref[:, :D] = x_rec.astype(out_ref.dtype)
    out_ref[:, D:] = hid.astype(out_ref.dtype)


def vae_forward(x, eps, params, latent_dim):
    """x: [B, input_dim] f32, eps: [B, latent_dim] f32 (reparam noise).
    Returns (x_rec, z_mu, z_logvar) — the VariationalAutoEncoder.forward outputs.
    """
    # TODO(synk): in production, eps could be generated in-kernel with
    # pltpu.prng_seed + pltpu.stateful_normal; it is passed in here so the
    # kernel is deterministic and checkable against a pure-JAX reference.
    B, D = x.shape
    H = params["w1"].shape[1]
    L2 = 2 * latent_dim
    P = max(H, L2, D)

    def row(name):
        v = jnp.asarray(params[name], jnp.float32).reshape(-1)
        return jnp.pad(v, (0, P - v.shape[0]))

    packed_vec = jnp.stack([row("g1"), row("be1"), row("g2"), row("be2"),
                            row("b3"), row("bd1"), row("bd2"), row("bd3")])

    bf16 = lambda name: params[name].astype(jnp.bfloat16)   # weights: bf16 MXU operands
    vmem = pl.BlockSpec(memory_space=pltpu.MemorySpace.VMEM)

    out = pl.pallas_call(
        functools.partial(vae_fused_kernel,
                          input_dim=D, hidden_dim=H, latent_dim=latent_dim),
        out_shape=jax.ShapeDtypeStruct((B, D + L2), jnp.float32),
        in_specs=[vmem] * 9,
        out_specs=vmem,
    )(x, eps,
      bf16("w1"), bf16("w2"), bf16("w3"),
      bf16("wd1"), bf16("wd2"), bf16("wd3"),
      packed_vec)

    x_rec = out[:, :D]
    z_mu = out[:, D:D + latent_dim]
    z_logvar = out[:, D + latent_dim:]
    return x_rec, z_mu, z_logvar


# ----------------------------------------------------------------------------
# Parameters & references
# ----------------------------------------------------------------------------
def init_params(key, input_dim, hidden_dim, latent_dim):
    """PyTorch-style init (uniform +-1/sqrt(fan_in)). BN gamma/beta are given
    small random values (instead of the trivial 1/0) so the affine path is
    actually exercised by the correctness check."""
    ks = jax.random.split(key, 16)

    def lin(kw, kb, fan_in, fan_out):
        bound = 1.0 / jnp.sqrt(jnp.float32(fan_in))
        w = jax.random.uniform(kw, (fan_in, fan_out), jnp.float32, -bound, bound)
        b = jax.random.uniform(kb, (fan_out,), jnp.float32, -bound, bound)
        return w, b

    w1, b1 = lin(ks[0], ks[1], input_dim, hidden_dim)
    w2, b2 = lin(ks[2], ks[3], hidden_dim, hidden_dim)
    w3, b3 = lin(ks[4], ks[5], hidden_dim, 2 * latent_dim)
    wd1, bd1 = lin(ks[6], ks[7], latent_dim, hidden_dim)
    wd2, bd2 = lin(ks[8], ks[9], hidden_dim, hidden_dim)
    wd3, bd3 = lin(ks[10], ks[11], hidden_dim, input_dim)

    g1 = 1.0 + 0.1 * jax.random.normal(ks[12], (hidden_dim,), jnp.float32)
    be1 = 0.1 * jax.random.normal(ks[13], (hidden_dim,), jnp.float32)
    g2 = 1.0 + 0.1 * jax.random.normal(ks[14], (hidden_dim,), jnp.float32)
    be2 = 0.1 * jax.random.normal(ks[15], (hidden_dim,), jnp.float32)

    return dict(w1=w1, b1=b1, g1=g1, be1=be1,
                w2=w2, b2=b2, g2=g2, be2=be2,
                w3=w3, b3=b3,
                wd1=wd1, bd1=bd1, wd2=wd2, bd2=bd2, wd3=wd3, bd3=bd3)


def vae_reference_matched(x, eps, p, latent_dim):
    """Pure-JAX reference using the exact same algebra as the kernel
    (bf16 dot operands, b1/b2 dropped, folded single-pass BN)."""
    bf = lambda n: p[n].astype(jnp.bfloat16)
    r = lambda n: jnp.asarray(p[n], jnp.float32).reshape(1, -1)
    x_rec, hid = _forward_core(
        x, eps, bf("w1"), bf("w2"), bf("w3"), bf("wd1"), bf("wd2"), bf("wd3"),
        r("g1"), r("be1"), r("g2"), r("be2"),
        r("b3"), r("bd1"), r("bd2"), r("bd3"), latent_dim)
    return x_rec, hid[:, :latent_dim], hid[:, latent_dim:]


def vae_reference_pytorch(x, eps, p, latent_dim):
    """PyTorch-faithful f32 formulation (with b1/b2, two-pass BN statistics)."""
    r = lambda n: jnp.asarray(p[n], jnp.float32).reshape(1, -1)

    def bn(h, gamma, beta):
        mean = jnp.mean(h, axis=0, keepdims=True)
        var = jnp.mean((h - mean) ** 2, axis=0, keepdims=True)
        return (h - mean) * jax.lax.rsqrt(var + BN_EPS) * gamma + beta

    h = x @ p["w1"] + r("b1")
    h = _leaky_relu(bn(h, r("g1"), r("be1")))
    h = h @ p["w2"] + r("b2")
    h = _leaky_relu(bn(h, r("g2"), r("be2")))
    hid = h @ p["w3"] + r("b3")
    z_mu, z_logvar = hid[:, :latent_dim], hid[:, latent_dim:]
    z = eps * jnp.exp(z_logvar) + z_mu
    d = _leaky_relu(z @ p["wd1"] + r("bd1"))
    d = _leaky_relu(d @ p["wd2"] + r("bd2"))
    x_rec = d @ p["wd3"] + r("bd3")
    return x_rec, z_mu, z_logvar


if __name__ == "__main__":
    B, INPUT_DIM, HIDDEN_DIM, LATENT_DIM = 8, 32, 64, 16

    key = jax.random.PRNGKey(0)
    kx, keps, kp = jax.random.split(key, 3)
    x = jax.random.normal(kx, (B, INPUT_DIM), jnp.float32)
    eps = jax.random.normal(keps, (B, LATENT_DIM), jnp.float32)
    params = init_params(kp, INPUT_DIM, HIDDEN_DIM, LATENT_DIM)

    x_rec, z_mu, z_logvar = vae_forward(x, eps, params, LATENT_DIM)
    jax.block_until_ready((x_rec, z_mu, z_logvar))

    # 1) Tight check against the algebra-matched pure-JAX reference
    #    (identical bf16-dot formulation; differences are lowering roundoff).
    rm_xrec, rm_mu, rm_lv = vae_reference_matched(x, eps, params, LATENT_DIM)
    assert jnp.allclose(z_mu, rm_mu, atol=5e-3, rtol=5e-3)
    assert jnp.allclose(z_logvar, rm_lv, atol=5e-3, rtol=5e-3)
    assert jnp.allclose(x_rec, rm_xrec, atol=5e-3, rtol=5e-3)

    # 2) Sanity check against the PyTorch-faithful f32 formulation (with b1/b2
    #    and two-pass BN); the only systematic difference is bf16 matmul
    #    rounding, so a looser tolerance applies.
    rp_xrec, rp_mu, rp_lv = vae_reference_pytorch(x, eps, params, LATENT_DIM)
    assert jnp.allclose(z_mu, rp_mu, atol=5e-2, rtol=5e-2)
    assert jnp.allclose(z_logvar, rp_lv, atol=5e-2, rtol=5e-2)
    assert jnp.allclose(x_rec, rp_xrec, atol=1e-1, rtol=1e-1)

    print("KERNEL_OK")
</pallas_src>

<mosaic_0001>
module attributes {stable_mosaic.version = 11 : i64} {
  func.func @vae_fused_kernel(%arg0: memref<8x32xf32, #tpu.memory_space<vmem>>, %arg1: memref<8x16xf32, #tpu.memory_space<vmem>>, %arg2: memref<32x64xbf16, #tpu.memory_space<vmem>>, %arg3: memref<64x64xbf16, #tpu.memory_space<vmem>>, %arg4: memref<64x32xbf16, #tpu.memory_space<vmem>>, %arg5: memref<16x64xbf16, #tpu.memory_space<vmem>>, %arg6: memref<64x64xbf16, #tpu.memory_space<vmem>>, %arg7: memref<64x32xbf16, #tpu.memory_space<vmem>>, %arg8: memref<8x64xf32, #tpu.memory_space<vmem>>, %arg9: memref<8x64xf32, #tpu.memory_space<vmem>>) attributes {dimension_semantics = [], scalar_prefetch = 0 : i64, scratch_operands = 0 : i64, tpu.core_type = #tpu.core_type<tc>} {
    %c0 = arith.constant 0 : index
    %c0_0 = arith.constant 0 : index
    %0 = vector.load %arg8[%c0, %c0_0] : memref<8x64xf32, #tpu.memory_space<vmem>>, vector<8x64xf32>
    %1 = vector.extract_strided_slice %0 {offsets = [0, 0], sizes = [1, 64], strides = [1, 1]} : vector<8x64xf32> to vector<1x64xf32>
    %2 = vector.extract_strided_slice %0 {offsets = [1, 0], sizes = [1, 64], strides = [1, 1]} : vector<8x64xf32> to vector<1x64xf32>
    %3 = vector.extract_strided_slice %0 {offsets = [2, 0], sizes = [1, 64], strides = [1, 1]} : vector<8x64xf32> to vector<1x64xf32>
    %4 = vector.extract_strided_slice %0 {offsets = [3, 0], sizes = [1, 64], strides = [1, 1]} : vector<8x64xf32> to vector<1x64xf32>
    %5 = vector.extract_strided_slice %0 {offsets = [4, 0], sizes = [1, 32], strides = [1, 1]} : vector<8x64xf32> to vector<1x32xf32>
    %6 = vector.extract_strided_slice %0 {offsets = [5, 0], sizes = [1, 64], strides = [1, 1]} : vector<8x64xf32> to vector<1x64xf32>
    %7 = vector.extract_strided_slice %0 {offsets = [6, 0], sizes = [1, 64], strides = [1, 1]} : vector<8x64xf32> to vector<1x64xf32>
    %8 = vector.extract_strided_slice %0 {offsets = [7, 0], sizes = [1, 32], strides = [1, 1]} : vector<8x64xf32> to vector<1x32xf32>
    %c0_1 = arith.constant 0 : index
    %c0_2 = arith.constant 0 : index
    %9 = vector.load %arg0[%c0_1, %c0_2] : memref<8x32xf32, #tpu.memory_space<vmem>>, vector<8x32xf32>
    %c0_3 = arith.constant 0 : index
    %c0_4 = arith.constant 0 : index
    %10 = vector.load %arg1[%c0_3, %c0_4] : memref<8x16xf32, #tpu.memory_space<vmem>>, vector<8x16xf32>
    %c0_5 = arith.constant 0 : index
    %c0_6 = arith.constant 0 : index
    %11 = vector.load %arg2[%c0_5, %c0_6] : memref<32x64xbf16, #tpu.memory_space<vmem>>, vector<32x64xbf16>
    %c0_7 = arith.constant 0 : index
    %c0_8 = arith.constant 0 : index
    %12 = vector.load %arg3[%c0_7, %c0_8] : memref<64x64xbf16, #tpu.memory_space<vmem>>, vector<64x64xbf16>
    %c0_9 = arith.constant 0 : index
    %c0_10 = arith.constant 0 : index
    %13 = vector.load %arg4[%c0_9, %c0_10] : memref<64x32xbf16, #tpu.memory_space<vmem>>, vector<64x32xbf16>
    %c0_11 = arith.constant 0 : index
    %c0_12 = arith.constant 0 : index
    %14 = vector.load %arg5[%c0_11, %c0_12] : memref<16x64xbf16, #tpu.memory_space<vmem>>, vector<16x64xbf16>
    %c0_13 = arith.constant 0 : index
    %c0_14 = arith.constant 0 : index
    %15 = vector.load %arg6[%c0_13, %c0_14] : memref<64x64xbf16, #tpu.memory_space<vmem>>, vector<64x64xbf16>
    %c0_15 = arith.constant 0 : index
    %c0_16 = arith.constant 0 : index
    %16 = vector.load %arg7[%c0_15, %c0_16] : memref<64x32xbf16, #tpu.memory_space<vmem>>, vector<64x32xbf16>
    %17 = arith.truncf %9 : vector<8x32xf32> to vector<8x32xbf16>
    %cst = arith.constant dense<0.000000e+00> : vector<8x64xf32>
    %18 = tpu.matmul %17, %11, %cst {dimension_numbers = #tpu.dot_dimension_numbers<[1], [0], [0], [1], [0, 0, 1, 1], [], []>} : vector<8x32xbf16>, vector<32x64xbf16>, vector<8x64xf32> -> vector<8x64xf32>
    %cst_17 = arith.constant dense<0.000000e+00> : vector<64xf32>
    %19 = vector.multi_reduction <add>, %18, %cst_17 [0] : vector<8x64xf32> to vector<64xf32>
    %20 = vector.shape_cast %19 : vector<64xf32> to vector<1x64xf32>
    %cst_18 = arith.constant 8.000000e+00 : f32
    %21 = vector.broadcast %cst_18 : f32 to vector<1x64xf32>
    %22 = arith.divf %20, %21 : vector<1x64xf32>
    %23 = arith.mulf %18, %18 : vector<8x64xf32>
    %cst_19 = arith.constant dense<0.000000e+00> : vector<64xf32>
    %24 = vector.multi_reduction <add>, %23, %cst_19 [0] : vector<8x64xf32> to vector<64xf32>
    %25 = vector.shape_cast %24 : vector<64xf32> to vector<1x64xf32>
    %cst_20 = arith.constant 8.000000e+00 : f32
    %26 = vector.broadcast %cst_20 : f32 to vector<1x64xf32>
    %27 = arith.divf %25, %26 : vector<1x64xf32>
    %28 = arith.mulf %22, %22 : vector<1x64xf32>
    %29 = arith.subf %27, %28 : vector<1x64xf32>
    %cst_21 = arith.constant 0.000000e+00 : f32
    %30 = vector.broadcast %cst_21 : f32 to vector<1x64xf32>
    %31 = arith.maximumf %29, %30 : vector<1x64xf32>
    %cst_22 = arith.constant 9.99999974E-6 : f32
    %32 = vector.broadcast %cst_22 : f32 to vector<1x64xf32>
    %33 = arith.addf %31, %32 : vector<1x64xf32>
    %34 = math.rsqrt %33 : vector<1x64xf32>
    %35 = arith.mulf %1, %34 : vector<1x64xf32>
    %36 = vector.broadcast %35 : vector<1x64xf32> to vector<8x64xf32>
    %37 = arith.mulf %18, %36 : vector<8x64xf32>
    %38 = arith.mulf %22, %35 : vector<1x64xf32>
    %39 = arith.subf %2, %38 : vector<1x64xf32>
    %40 = vector.broadcast %39 : vector<1x64xf32> to vector<8x64xf32>
    %41 = arith.addf %37, %40 : vector<8x64xf32>
    %cst_23 = arith.constant 0.000000e+00 : f32
    %42 = vector.broadcast %cst_23 : f32 to vector<8x64xf32>
    %43 = arith.cmpf ogt, %41, %42 : vector<8x64xf32>
    %cst_24 = arith.constant 2.000000e-01 : f32
    %44 = vector.broadcast %cst_24 : f32 to vector<8x64xf32>
    %45 = arith.mulf %44, %41 : vector<8x64xf32>
    %46 = arith.select %43, %41, %45 : vector<8x64xi1>, vector<8x64xf32>
    %47 = arith.truncf %46 : vector<8x64xf32> to vector<8x64xbf16>
    %cst_25 = arith.constant dense<0.000000e+00> : vector<8x64xf32>
    %48 = tpu.matmul %47, %12, %cst_25 {dimension_numbers = #tpu.dot_dimension_numbers<[1], [0], [0], [1], [0, 0, 1, 1], [], []>} : vector<8x64xbf16>, vector<64x64xbf16>, vector<8x64xf32> -> vector<8x64xf32>
    %cst_26 = arith.constant dense<0.000000e+00> : vector<64xf32>
    %49 = vector.multi_reduction <add>, %48, %cst_26 [0] : vector<8x64xf32> to vector<64xf32>
    %50 = vector.shape_cast %49 : vector<64xf32> to vector<1x64xf32>
    %cst_27 = arith.constant 8.000000e+00 : f32
    %51 = vector.broadcast %cst_27 : f32 to vector<1x64xf32>
    %52 = arith.divf %50, %51 : vector<1x64xf32>
    %53 = arith.mulf %48, %48 : vector<8x64xf32>
    %cst_28 = arith.constant dense<0.000000e+00> : vector<64xf32>
    %54 = vector.multi_reduction <add>, %53, %cst_28 [0] : vector<8x64xf32> to vector<64xf32>
    %55 = vector.shape_cast %54 : vector<64xf32> to vector<1x64xf32>
    %cst_29 = arith.constant 8.000000e+00 : f32
    %56 = vector.broadcast %cst_29 : f32 to vector<1x64xf32>
    %57 = arith.divf %55, %56 : vector<1x64xf32>
    %58 = arith.mulf %52, %52 : vector<1x64xf32>
    %59 = arith.subf %57, %58 : vector<1x64xf32>
    %cst_30 = arith.constant 0.000000e+00 : f32
    %60 = vector.broadcast %cst_30 : f32 to vector<1x64xf32>
    %61 = arith.maximumf %59, %60 : vector<1x64xf32>
    %cst_31 = arith.constant 9.99999974E-6 : f32
    %62 = vector.broadcast %cst_31 : f32 to vector<1x64xf32>
    %63 = arith.addf %61, %62 : vector<1x64xf32>
    %64 = math.rsqrt %63 : vector<1x64xf32>
    %65 = arith.mulf %3, %64 : vector<1x64xf32>
    %66 = vector.broadcast %65 : vector<1x64xf32> to vector<8x64xf32>
    %67 = arith.mulf %48, %66 : vector<8x64xf32>
    %68 = arith.mulf %52, %65 : vector<1x64xf32>
    %69 = arith.subf %4, %68 : vector<1x64xf32>
    %70 = vector.broadcast %69 : vector<1x64xf32> to vector<8x64xf32>
    %71 = arith.addf %67, %70 : vector<8x64xf32>
    %cst_32 = arith.constant 0.000000e+00 : f32
    %72 = vector.broadcast %cst_32 : f32 to vector<8x64xf32>
    %73 = arith.cmpf ogt, %71, %72 : vector<8x64xf32>
    %cst_33 = arith.constant 2.000000e-01 : f32
    %74 = vector.broadcast %cst_33 : f32 to vector<8x64xf32>
    %75 = arith.mulf %74, %71 : vector<8x64xf32>
    %76 = arith.select %73, %71, %75 : vector<8x64xi1>, vector<8x64xf32>
    %77 = arith.truncf %76 : vector<8x64xf32> to vector<8x64xbf16>
    %cst_34 = arith.constant dense<0.000000e+00> : vector<8x32xf32>
    %78 = tpu.matmul %77, %13, %cst_34 {dimension_numbers = #tpu.dot_dimension_numbers<[1], [0], [0], [1], [0, 0, 1, 1], [], []>} : vector<8x64xbf16>, vector<64x32xbf16>, vector<8x32xf32> -> vector<8x32xf32>
    %79 = vector.broadcast %5 : vector<1x32xf32> to vector<8x32xf32>
    %80 = arith.addf %78, %79 : vector<8x32xf32>
    %81 = vector.extract_strided_slice %80 {offsets = [0, 0], sizes = [8, 16], strides = [1, 1]} : vector<8x32xf32> to vector<8x16xf32>
    %82 = vector.extract_strided_slice %80 {offsets = [0, 16], sizes = [8, 16], strides = [1, 1]} : vector<8x32xf32> to vector<8x16xf32>
    %83 = math.exp %82 : vector<8x16xf32>
    %84 = arith.mulf %10, %83 : vector<8x16xf32>
    %85 = arith.addf %84, %81 : vector<8x16xf32>
    %86 = arith.truncf %85 : vector<8x16xf32> to vector<8x16xbf16>
    %cst_35 = arith.constant dense<0.000000e+00> : vector<8x64xf32>
    %87 = tpu.matmul %86, %14, %cst_35 {dimension_numbers = #tpu.dot_dimension_numbers<[1], [0], [0], [1], [0, 0, 1, 1], [], []>} : vector<8x16xbf16>, vector<16x64xbf16>, vector<8x64xf32> -> vector<8x64xf32>
    %88 = vector.broadcast %6 : vector<1x64xf32> to vector<8x64xf32>
    %89 = arith.addf %87, %88 : vector<8x64xf32>
    %cst_36 = arith.constant 0.000000e+00 : f32
    %90 = vector.broadcast %cst_36 : f32 to vector<8x64xf32>
    %91 = arith.cmpf ogt, %89, %90 : vector<8x64xf32>
    %cst_37 = arith.constant 2.000000e-01 : f32
    %92 = vector.broadcast %cst_37 : f32 to vector<8x64xf32>
    %93 = arith.mulf %92, %89 : vector<8x64xf32>
    %94 = arith.select %91, %89, %93 : vector<8x64xi1>, vector<8x64xf32>
    %95 = arith.truncf %94 : vector<8x64xf32> to vector<8x64xbf16>
    %cst_38 = arith.constant dense<0.000000e+00> : vector<8x64xf32>
    %96 = tpu.matmul %95, %15, %cst_38 {dimension_numbers = #tpu.dot_dimension_numbers<[1], [0], [0], [1], [0, 0, 1, 1], [], []>} : vector<8x64xbf16>, vector<64x64xbf16>, vector<8x64xf32> -> vector<8x64xf32>
    %97 = vector.broadcast %7 : vector<1x64xf32> to vector<8x64xf32>
    %98 = arith.addf %96, %97 : vector<8x64xf32>
    %cst_39 = arith.constant 0.000000e+00 : f32
    %99 = vector.broadcast %cst_39 : f32 to vector<8x64xf32>
    %100 = arith.cmpf ogt, %98, %99 : vector<8x64xf32>
    %cst_40 = arith.constant 2.000000e-01 : f32
    %101 = vector.broadcast %cst_40 : f32 to vector<8x64xf32>
    %102 = arith.mulf %101, %98 : vector<8x64xf32>
    %103 = arith.select %100, %98, %102 : vector<8x64xi1>, vector<8x64xf32>
    %104 = arith.truncf %103 : vector<8x64xf32> to vector<8x64xbf16>
    %cst_41 = arith.constant dense<0.000000e+00> : vector<8x32xf32>
    %105 = tpu.matmul %104, %16, %cst_41 {dimension_numbers = #tpu.dot_dimension_numbers<[1], [0], [0], [1], [0, 0, 1, 1], [], []>} : vector<8x64xbf16>, vector<64x32xbf16>, vector<8x32xf32> -> vector<8x32xf32>
    %106 = vector.broadcast %8 : vector<1x32xf32> to vector<8x32xf32>
    %107 = arith.addf %105, %106 : vector<8x32xf32>
    %c0_42 = arith.constant 0 : index
    %c0_43 = arith.constant 0 : index
    %108 = vector.load %arg9[%c0_42, %c0_43] : memref<8x64xf32, #tpu.memory_space<vmem>>, vector<8x32xf32>
    tpu.vector_store %arg9[%c0_42, %c0_43], %107 {strides = array<i32>} : memref<8x64xf32, #tpu.memory_space<vmem>>, vector<8x32xf32>,
    %c0_44 = arith.constant 0 : index
    %c32 = arith.constant 32 : index
    %109 = vector.load %arg9[%c0_44, %c32] : memref<8x64xf32, #tpu.memory_space<vmem>>, vector<8x32xf32>
    tpu.vector_store %arg9[%c0_44, %c32], %80 {strides = array<i32>} : memref<8x64xf32, #tpu.memory_space<vmem>>, vector<8x32xf32>,
    return
  }
}

</mosaic_0001>

<bundles_post_ra>
// kernel: tpu_custom_call.1
= control target key start
LH: loop header
LB: loop body
LE: loop exit
PB: predicated region body
PF: predicated region fallthrough
CT: control target
= control target key end

     0   :  { %14 = vsyncpa [#allocation3], 0  ;;  %s1046_s0 = inlined_call_operand.hbm [shape: f32[8,32], index: 0, kind: input, shape index: {}]   ;;  %s1047_s1 = inlined_call_operand.hbm [shape: f32[8,16], index: 1, kind: input, shape index: {}]   ;;  %s1048_s2 = inlined_call_operand.vmem [shape: bf16[32,64], index: 2, kind: input, shape index: {}]   ;;  %s1049_s3 = inlined_call_operand.vmem [shape: bf16[64,64], index: 3, kind: input, shape index: {}]   ;;  %s1050_s4 = inlined_call_operand.vmem [shape: bf16[64,32], index: 4, kind: input, shape index: {}]   ;;  %s1051_s5 = inlined_call_operand.vmem [shape: bf16[16,64], index: 5, kind: input, shape index: {}]   ;;  %s1052_s6 = inlined_call_operand.vmem [shape: bf16[64,64], index: 6, kind: input, shape index: {}]   ;;  %s1053_s7 = inlined_call_operand.vmem [shape: bf16[64,32], index: 7, kind: input, shape index: {}]   ;;  %s1054_s8 = inlined_call_operand.vmem [shape: f32[8,64], index: 8, kind: input, shape index: {}]   ;;  %s1055_s9 = inlined_call_operand.hbm [shape: f32[8,64], index: 9, kind: output, shape index: {}]  }
   0x1   :  { %15 = vsyncpa [#allocation6], 0 }
   0x2   :  { %16 = vsyncpa [#allocation4], 0  ;;  %s832_s30 = smov [#allocation2]   ;;  %s833_s11 = smov [#allocation5]  }
   0x3   :  { %s23_s10 = sshll.u32 %s832_s30, 4  ;;  %s33_s12 = sshll.u32 %s833_s11, 4  ;;  %s24_s10 = int_to_ptr.vmem [resolvable:$true] %s23_s10  ;;  %s34_s12 = int_to_ptr.vmem [resolvable:$true] %s33_s12 }
   0x4   :  { %s760_s15 = scalar_lea.hbm %s1046_s0, 128 }
   0x5   :  { %p761_p0 = scmp.ne.s32.totalorder %s1046_s0, %s760_s15  ;;  %p764_p1 = scmp.lt.u32.totalorder %s760_s15, %s1046_s0 }
   0x7   :  { %p766_p2 = pnand %p764_p1, %p761_p0 }
   0x9   :  { %769 = shalt.err (!%p766_p2)
}
   0xa   :  { %s770_s20 = scalar_lea.vmem %s24_s10, 128  ;;  %p775_p4 = scmp.lt.s32.totalorder %s24_s10, %s24_s10 }
   0xb   :  { %p771_p3 = scmp.ne.s32.totalorder %s24_s10, %s770_s20  ;;  %p776_p5 = scmp.lt.s32.totalorder %s770_s20, %s770_s20 }
   0xd   :  { %p777_p6 = por %p776_p5, %p775_p4 }
   0xf   :  { %p778_p7 = pnand %p777_p6, %p771_p3 }
  0x11   :  { %781 = shalt.err (!%p778_p7)
}
  0x12   :  { %26 = dma.hbm_to_vmem [thread:$0]  %s1046_s0, 128, %s24_s10, [#allocation3]  }
  0x13   :  { %s782_s25 = scalar_lea.hbm %s1047_s1, 128 }
  0x14   :  { %p783_p8 = scmp.ne.s32.totalorder %s1047_s1, %s782_s25  ;;  %p786_p9 = scmp.lt.u32.totalorder %s782_s25, %s1047_s1 }
  0x16   :  { %p788_p10 = pnand %p786_p9, %p783_p8 }
  0x18   :  { %791 = shalt.err (!%p788_p10)
}
  0x19   :  { %s792_s30 = scalar_lea.vmem %s34_s12, 128  ;;  %p797_p12 = scmp.lt.s32.totalorder %s34_s12, %s34_s12 }
  0x1a   :  { %p793_p11 = scmp.ne.s32.totalorder %s34_s12, %s792_s30  ;;  %p798_p13 = scmp.lt.s32.totalorder %s792_s30, %s792_s30 }
  0x1c   :  { %p799_p0 = por %p798_p13, %p797_p12 }
  0x1e   :  { %p800_p1 = pnand %p799_p0, %p793_p11 }
  0x20   :  { %803 = shalt.err (!%p800_p1)
}
  0x21   :  { %36 = dma.hbm_to_vmem [thread:$0]  %s1047_s1, 128, %s34_s12, [#allocation6]  }
  0x22   :  { %826 = dma.done.wait [#allocation3], 128  }
  0x23   :  { %827 = vsyncadd [#allocation3], 4294967168 }
  0x24   :  { %828 = dma.done.wait [#allocation6], 128  }
  0x25   :  { %829 = vsyncadd [#allocation6], 4294967168  ;;  %v834_v0 = vmov 0.0   ;;  %vm835_vm0 = vmmov 0   ;;  %v735_v1 = vld [vmem:[%s1048_s2] sm:$0xff]   ;;  %v736_v2 = vld [vmem:[%s1048_s2 + $0x8] sm:$0xff]   ;;  %v181_v34 = vlaneseq }
  0x26   :  { %666 = vmatprep.subr.bf16.mxu0 %v834_v0  ;;  %670 = vmatprep.mubr.msk.bf16.mxu0 %vm835_vm0, %v834_v0  ;;  %v59_v3 = vld [vmem:[#allocation2] sm:$0xff]  ;;  %vm112_vm1 = vcmask 261120   ;;  %v738_v6 = vld [vmem:[%s1049_s3 + $0x8] sm:$0xff]   ;;  %v739_v7 = vld [vmem:[%s1049_s3 + $0x10] sm:$0xff]   ;;  %vm156_vm2 = vcmask 523264   ;;  %s836_s11 = smov 112  }
  0x27   :  { %674 = vmatprep.subr.bf16.mxu1 %v834_v0  ;;  %682 = vmatprep.mubr.msk.bf16.mxu1 %vm835_vm0, %v834_v0  ;;  %v99_v4 = vpack.c.bf16 %v59_v3, %v59_v3  ;;  %v737_v5 = vld [vmem:[%s1049_s3] sm:$0xff]   ;;  %v740_v8 = vld [vmem:[%s1049_s3 + $0x18] sm:$0xff]   ;;  %v948_v35 = vshrl.u32 %v181_v34, 7  ;;  %v742_v52 = vld [vmem:[%s1050_s4 + $0x8] sm:$0xff]   ;;  %s837_s13 = smov 32   ;;  %vm399_vm5 = vcmask 130048  }
  0x28   :  { %667 = vmatpush3.bf16.msra.mxu0 %v735_v1  ;;  %675 = vmatpush3.bf16.msra.mxu1 %v737_v5  ;;  %v953_v36 = vld [vmem:[%s1054_s8] sm:$0xff]  ;;  %v743_v53 = vld [vmem:[%s1050_s4 + $0x10] sm:$0xff]   ;;  %v744_v54 = vld [vmem:[%s1050_s4 + $0x18] sm:$0xff]   ;;  %vm598_vm8 = vcmask 523520  }
  0x29   :  { %668 = vmatprep.subr.bf16.mxu0 %v834_v0  ;;  %676 = vmatprep.subr.bf16.mxu1 %v834_v0  ;;  %v183_v39 = vsub.s32 0, %v948_v35  ;;  %v193_v43 = vsub.s32 1, %v948_v35  ;;  %v741_v51 = vld [vmem:[%s1050_s4] sm:$0xff]  }
  0x2c   :  { %669 = vmatpush3.bf16.msra.mxu0 %v736_v2  ;;  %677 = vmatpush3.bf16.msra.mxu1 %v738_v6 }
  0x2d   :  { %686 = vmatprep.subr.bf16.mxu0 %v834_v0  ;;  %678 = vmatprep.subr.bf16.mxu1 %v834_v0 }
  0x2f   :  { %671 = vmatmul.mubr.msk.bf16.vlgmr.msra.gmra.mrb[0].mxu0 %vm112_vm1, %v99_v4 }
  0x30   :  { %694 = vmatprep.mubr.msk.bf16.mxu0 %vm835_vm0, %v834_v0  ;;  %679 = vmatpush3.bf16.msra.mxu1 %v739_v7 }
  0x31   :  { %680 = vmatprep.subr.bf16.mxu1 %v834_v0  ;;  %687 = vmatpush3.bf16.msra.mxu0 %v741_v51  ;;  %v749_v51 = vld [vmem:[%s1052_s6 + $0x18] sm:$0xff]  }
  0x32   :  { %688 = vmatprep.subr.bf16.mxu0 %v834_v0 }
  0x34   :  { %681 = vmatpush3.bf16.msra.mxu1 %v740_v8 }
  0x35   :  { %698 = vmatprep.subr.bf16.mxu1 %v834_v0  ;;  %689 = vmatpush3.bf16.msra.mxu0 %v742_v52  ;;  %v750_v52 = vld [vmem:[%s1053_s7] sm:$0xff]  }
  0x36   :  { %690 = vmatprep.subr.bf16.mxu0 %v834_v0 }
  0x39   :  { %691 = vmatpush3.bf16.msra.mxu0 %v743_v53  ;;  %v751_v53 = vld [vmem:[%s1053_s7 + $0x8] sm:$0xff]  }
  0x3a   :  { %692 = vmatprep.subr.bf16.mxu0 %v834_v0 }
  0x3d   :  { %693 = vmatpush3.bf16.msra.mxu0 %v744_v54  ;;  %v391_v54 = vsub.s32 5, %v948_v35 }
  0x3e   :  { %704 = vmatprep.subr.bf16.mxu0 %v834_v0 }
 0x102   :  { %v150_v9 = vpop.f32.mrb[0].mxu0 }
 0x103   :  { %v157_v10 = vsel %vm156_vm2, %v150_v9, 0.0  ;;  %v166_v11 = vmul.f32 %v150_v9, %v150_v9  ;;  %v672_v12 = vpop.f32.mrb[1].mxu0 }
 0x104   :  { %v158_v13 = vrot.slane %v157_v10, 4  ;;  %v153_v14 = vpop.f32.mrb[2].mxu0 }
 0x105   :  { %v167_v15 = vsel %vm156_vm2, %v166_v11, 0.0  ;;  %v673_v16 = vpop.f32.mrb[3].mxu0 }
 0x106   :  { %v159_v17 = vadd.f32 %v158_v13, %v157_v10  ;;  %v168_v18 = vrot.slane %v167_v15, 4 }
 0x108   :  { %v160_v19 = vrot.slane %v159_v17, 2  ;;  %v169_v20 = vadd.f32 %v168_v18, %v167_v15 }
 0x10a   :  { %v161_v21 = vadd.f32 %v160_v19, %v159_v17  ;;  %v170_v22 = vrot.slane %v169_v20, 2  ;;  %v292_v19 = vsub.s32 2, %v948_v35 }
 0x10c   :  { %v162_v23 = vrot.slane %v161_v21, 1  ;;  %v171_v24 = vadd.f32 %v170_v22, %v169_v20 }
 0x10e   :  { %v163_v25 = vadd.f32 %v162_v23, %v161_v21  ;;  %v172_v26 = vrot.slane %v171_v24, 1  ;;  %v302_v23 = vsub.s32 3, %v948_v35 }
 0x110   :  { %v165_v27 = vmul.f32 0.125, %v163_v25  ;;  %v173_v28 = vadd.f32 %v172_v26, %v171_v24 }
 0x112   :  { %v174_v29 = vmul.f32 0.125, %v173_v28  ;;  %v175_v30 = vmul.f32 %v165_v27, %v165_v27 }
 0x114   :  { %v176_v31 = vsub.f32 %v174_v29, %v175_v30 }
 0x116   :  { %v177_v32 = vmax.f32 %v176_v31, 0.0  ;;  %v745_v31 = vld [vmem:[%s1051_s5] sm:$0xff]  }
 0x118   :  { %v178_v33 = vadd.f32 1e-05, %v177_v32  ;;  %v311_v32 = vsub.s32 4, %v948_v35 }
 0x11a   :  { %754 = vrsqrt.f32 %v178_v33  ;;  %v312_v33 = vrot.slane %v953_v36, %v311_v32 }
 0x124   :  { %v755_v37 = vpop.eup %754 }
 0x125   :  { %v180_v38 = vmul.f32 %v755_v37, %v953_v36 }
 0x127   :  { %v186_v40 = vmul.f32 %v180_v38, %v165_v27  ;;  %v184_v41 = vrot.slane %v180_v38, %v183_v39 }
 0x129   :  { %v188_v42 = vrot.slane %v186_v40, 7  ;;  %v185_v45 = vmul.f32 %v184_v41, %v150_v9 }
 0x12b   :  { %v190_v44 = vsub.f32 %v953_v36, %v188_v42  ;;  %v746_v42 = vld [vmem:[%s1052_s6] sm:$0xff]  }
 0x12d   :  { %v194_v46 = vrot.slane %v190_v44, %v193_v43  ;;  %v747_v43 = vld [vmem:[%s1052_s6 + $0x8] sm:$0xff]  }
 0x12f   :  { %v195_v47 = vadd.f32 %v194_v46, %v185_v45  ;;  %v60_v45 = vld [vmem:[#allocation5] sm:$0xff] }
 0x131   :  { %v197_v48 = vmul.f32 0.2, %v195_v47  ;;  %vm196_vm3 = vcmp.gt.f32.partialorder %v195_v47, 0.0 }
 0x133   :  { %v198_v49 = vsel %vm196_vm3, %v195_v47, %v197_v48 }
 0x134   :  { %v199_v50 = vpack.c.bf16 %v198_v49, %v198_v49 }
 0x136   :  { %683 = vmatmul.mubr.msk.bf16.vlgmr.msra.gmra.mrb[0].mxu1 %vm156_vm2, %v199_v50  ;;  %v748_v50 = vld [vmem:[%s1052_s6 + $0x10] sm:$0xff]  }
 0x137   :  { %700 = vmatprep.mubr.msk.bf16.mxu1 %vm835_vm0, %v834_v0  ;;  %699 = vmatpush3.bf16.msra.mxu1 %v745_v31 }
 0x138   :  { %716 = vmatprep.subr.bf16.mxu1 %v834_v0 }
 0x209   :  { %v261_v55 = vpop.f32.mrb[0].mxu1 }
 0x20a   :  { %v267_v56 = vsel %vm156_vm2, %v261_v55, 0.0  ;;  %v275_v57 = vmul.f32 %v261_v55, %v261_v55  ;;  %v684_v58 = vpop.f32.mrb[1].mxu1 }
 0x20b   :  { %v268_v59 = vrot.slane %v267_v56, 4  ;;  %v264_v60 = vpop.f32.mrb[2].mxu1 }
 0x20c   :  { %v276_v61 = vsel %vm156_vm2, %v275_v57, 0.0  ;;  %v685_v62 = vpop.f32.mrb[3].mxu1 }
 0x20d   :  { %v269_v63 = vadd.f32 %v268_v59, %v267_v56  ;;  %v277_v1 = vrot.slane %v276_v61, 4 }
 0x20f   :  { %v270_v2 = vrot.slane %v269_v63, 2  ;;  %v278_v3 = vadd.f32 %v277_v1, %v276_v61  ;;  %v752_v1 = vld [vmem:[%s1053_s7 + $0x10] sm:$0xff]  }
 0x211   :  { %v271_v4 = vadd.f32 %v270_v2, %v269_v63  ;;  %v279_v5 = vrot.slane %v278_v3, 2  ;;  %v753_v2 = vld [vmem:[%s1053_s7 + $0x18] sm:$0xff]   ;;  %s838_s7 = smov [#allocation7]  }
 0x212   :  { %s606_s21 = sshll.u32 %s838_s7, 4  ;;  %s607_s21 = int_to_ptr.vmem [resolvable:$true] %s606_s21 }
 0x213   :  { %v272_v6 = vrot.slane %v271_v4, 1  ;;  %v280_v7 = vadd.f32 %v279_v5, %v278_v3  ;;  %v449_v3 = vsub.s32 6, %v948_v35  ;;  %s804_s8 = scalar_lea.vmem %s607_s21, 128  ;;  %p809_p3 = scmp.lt.s32.totalorder %s607_s21, %s607_s21 }
 0x214   :  { %p805_p2 = scmp.ne.s32.totalorder %s607_s21, %s804_s8  ;;  %p810_p4 = scmp.lt.s32.totalorder %s804_s8, %s804_s8 }
 0x215   :  { %v273_v8 = vadd.f32 %v272_v6, %v271_v4  ;;  %v281_v9 = vrot.slane %v280_v7, 1  ;;  %v450_v4 = vrot.slane %v953_v36, %v449_v3 }
 0x216   :  { %p811_p5 = por %p810_p4, %p809_p3 }
 0x217   :  { %v274_v10 = vmul.f32 0.125, %v273_v8  ;;  %v282_v11 = vadd.f32 %v281_v9, %v280_v7 }
 0x218   :  { %p812_p6 = pnand %p811_p5, %p805_p2 }
 0x219   :  { %v283_v12 = vmul.f32 0.125, %v282_v11  ;;  %v284_v13 = vmul.f32 %v274_v10, %v274_v10 }
 0x21b   :  { %v285_v14 = vsub.f32 %v283_v12, %v284_v13 }
 0x21d   :  { %v286_v15 = vmax.f32 %v285_v14, 0.0 }
 0x21f   :  { %v287_v16 = vadd.f32 1e-05, %v286_v15 }
 0x221   :  { %756 = vrsqrt.f32 %v287_v16 }
 0x22b   :  { %v757_v17 = vpop.eup %756 }
 0x22c   :  { %v289_v18 = vmul.f32 %v757_v17, %v953_v36 }
 0x22e   :  { %v295_v20 = vmul.f32 %v289_v18, %v274_v10  ;;  %v293_v21 = vrot.slane %v289_v18, %v292_v19 }
 0x230   :  { %v297_v22 = vrot.slane %v295_v20, 7  ;;  %v294_v25 = vmul.f32 %v293_v21, %v261_v55  ;;  %v392_v55 = vrot.slane %v953_v36, %v391_v54 }
 0x232   :  { %v299_v24 = vsub.f32 %v953_v36, %v297_v22 }
 0x234   :  { %v303_v26 = vrot.slane %v299_v24, %v302_v23 }
 0x236   :  { %v304_v27 = vadd.f32 %v303_v26, %v294_v25 }
 0x238   :  { %vm305_vm4 = vcmp.gt.f32.partialorder %v304_v27, 0.0  ;;  %v306_v28 = vmul.f32 0.2, %v304_v27 }
 0x23a   :  { %v307_v29 = vsel %vm305_vm4, %v304_v27, %v306_v28 }
 0x23b   :  { %v308_v30 = vpack.c.bf16 %v307_v29, %v307_v29 }
 0x23d   :  { %695 = vmatmul.mubr.msk.bf16.vlgmr.msra.gmra.mrb[4].mxu0 %vm156_vm2, %v308_v30 }
 0x23e   :  { %712 = vmatprep.mubr.msk.bf16.mxu0 %vm835_vm0, %v834_v0  ;;  %705 = vmatpush3.bf16.msra.mxu0 %v746_v42 }
 0x23f   :  { %706 = vmatprep.subr.bf16.mxu0 %v834_v0 }
 0x242   :  { %707 = vmatpush3.bf16.msra.mxu0 %v747_v43 }
 0x243   :  { %708 = vmatprep.subr.bf16.mxu0 %v834_v0 }
 0x246   :  { %709 = vmatpush3.bf16.msra.mxu0 %v748_v50 }
 0x247   :  { %710 = vmatprep.subr.bf16.mxu0 %v834_v0 }
 0x24a   :  { %711 = vmatpush3.bf16.msra.mxu0 %v749_v51 }
 0x310   :  { %v374_v34 = vpop.f32.mrb[4].mxu0 }
 0x311   :  { %v375_v37 = vadd.f32 %v374_v34, %v312_v33  ;;  %v696_v38 = vpop.f32.mrb[5].mxu0 }
 0x312   :  { %v377_v39 = vpop.f32.mrb[6].mxu0 }
 0x313   :  { %v380_v40 = vmul.f32 1.442695, %v375_v37  ;;  %v697_v41 = vpop.f32.mrb[7].mxu0 }
 0x315   :  { %758 = vpow2.f32 %v380_v40 }
 0x31f   :  { %v759_v44 = vpop.eup %758 }
 0x320   :  { %383 = vrot.lane.b32.xlu0 %v759_v44, %s836_s11 }
 0x324   :  { %595 = vrot.lane.b32.xlu0 %v375_v37, %s837_s13 }
 0x392   :  { %v384_v46 = vpop.permute.xlu0 %383 }
 0x393   :  { %v386_v47 = vmul.f32 %v384_v46, %v60_v45 }
 0x395   :  { %v387_v48 = vadd.f32 %v386_v47, %v375_v37 }
 0x396   :  { %v596_v18 = vpop.permute.xlu0 %595 }
 0x397   :  { %v388_v49 = vpack.c.bf16 %v387_v48, %v387_v48 }
 0x399   :  { %701 = vmatmul.mubr.msk.bf16.vlgmr.msra.gmra.mrb[4].mxu1 %vm399_vm5, %v388_v49 }
 0x39a   :  { %724 = vmatprep.mubr.msk.bf16.mxu1 %vm835_vm0, %v834_v0  ;;  %717 = vmatpush3.bf16.msra.mxu1 %v750_v52 }
 0x39b   :  { %718 = vmatprep.subr.bf16.mxu1 %v834_v0 }
 0x39e   :  { %719 = vmatpush3.bf16.msra.mxu1 %v751_v53 }
 0x39f   :  { %720 = vmatprep.subr.bf16.mxu1 %v834_v0 }
 0x3a2   :  { %721 = vmatpush3.bf16.msra.mxu1 %v752_v1 }
 0x3a3   :  { %722 = vmatprep.subr.bf16.mxu1 %v834_v0  ;;  %v524_v0 = vsub.s32 7, %v948_v35 }
 0x3a5   :  { %v525_v13 = vrot.slane %v953_v36, %v524_v0 }
 0x3a6   :  { %723 = vmatpush3.bf16.msra.mxu1 %v753_v2 }
 0x46c   :  { %v437_v56 = vpop.f32.mrb[4].mxu1 }
 0x46d   :  { %v438_v57 = vadd.f32 %v437_v56, %v392_v55  ;;  %v702_v58 = vpop.f32.mrb[5].mxu1 }
 0x46e   :  { %v440_v59 = vpop.f32.mrb[6].mxu1 }
 0x46f   :  { %vm443_vm6 = vcmp.gt.f32.partialorder %v438_v57, 0.0  ;;  %v444_v60 = vmul.f32 0.2, %v438_v57  ;;  %v703_v61 = vpop.f32.mrb[7].mxu1 }
 0x471   :  { %v445_v62 = vsel %vm443_vm6, %v438_v57, %v444_v60 }
 0x472   :  { %v446_v63 = vpack.c.bf16 %v445_v62, %v445_v62 }
 0x474   :  { %713 = vmatmul.mubr.msk.bf16.vlgmr.msra.gmra.mrb[8].mxu0 %vm156_vm2, %v446_v63 }
 0x547   :  { %v512_v5 = vpop.f32.mrb[8].mxu0 }
 0x548   :  { %v513_v6 = vadd.f32 %v512_v5, %v450_v4  ;;  %v714_v7 = vpop.f32.mrb[9].mxu0 }
 0x549   :  { %v515_v8 = vpop.f32.mrb[10].mxu0 }
 0x54a   :  { %vm518_vm7 = vcmp.gt.f32.partialorder %v513_v6, 0.0  ;;  %v519_v9 = vmul.f32 0.2, %v513_v6  ;;  %v715_v10 = vpop.f32.mrb[11].mxu0 }
 0x54c   :  { %v520_v11 = vsel %vm518_vm7, %v513_v6, %v519_v9 }
 0x54d   :  { %v521_v12 = vpack.c.bf16 %v520_v11, %v520_v11 }
 0x54f   :  { %725 = vmatmul.mubr.msk.bf16.vlgmr.msra.gmra.mrb[8].mxu1 %vm156_vm2, %v521_v12 }
 0x622   :  { %v587_v14 = vpop.f32.mrb[8].mxu1 }
 0x623   :  { %v588_v15 = vadd.f32 %v587_v14, %v525_v13  ;;  %v726_v16 = vpop.f32.mrb[9].mxu1 }
 0x624   :  { %v590_v17 = vpop.f32.mrb[10].mxu1 }
 0x625   :  { %593 = vst.msk [vmem:[#allocation7] sm:$0xff] %vm112_vm1, %v588_v15  ;;  %v727_v19 = vpop.f32.mrb[11].mxu1 }
 0x626   :  { %599 = vst.msk [vmem:[#allocation7] sm:$0xff] %vm598_vm8, %v596_v18 }
 0x627   :  { %815 = shalt.err (!%p812_p6)
}
 0x628   :  { %s816_s24 = scalar_lea.hbm %s1055_s9, 128 }
 0x629   :  { %p817_p7 = scmp.ne.s32.totalorder %s1055_s9, %s816_s24  ;;  %p820_p8 = scmp.lt.u32.totalorder %s816_s24, %s1055_s9 }
 0x62b   :  { %p822_p9 = pnand %p820_p8, %p817_p7 }
 0x62d   :  { %825 = shalt.err (!%p822_p9)
}
 0x62e   :  { %609 = dma.vmem_to_hbm [thread:$0]  %s607_s21, 128, %s1055_s9, [#allocation4]  }
 0x62f   :  { %830 = dma.done.wait [#allocation4], 128  }
 0x630   :  { %831 = vsyncadd [#allocation4], 4294967168 }
 0x631   :  { %613 = vsyncpa [#allocation3], 1 }
 0x632   :  { %614 = vsyncpa [#allocation6], 1 }
 0x633   :  { %615 = vsyncpa [#allocation4], 1 }

</bundles_post_ra>
